<compile_context>
chip_gen: v6e
topology: v6e:2x2x1
jax: 0.10.0
libtpu: 0.0.40
codegen_flags: <defaults>
</compile_context>

<pallas_src>
import math

import jax
import jax.numpy as jnp
from jax.experimental import pallas as pl
from jax.experimental.pallas import tpu as pltpu


_LANE = 1024                       # lane-dense last dim (multiple of 128)
_MAX_TILE_ROWS = 1024              # (1024, 1024) f32 tile = 4 MiB per buffer
_PER_SAMPLE_TILE_BYTES = 2 * 1024 * 1024


def _cdiv(a, b):
    return -(-a // b)


def _round_up(x, m):
    return ((x + m - 1) // m) * m


def _needs_f32_upcast(dtype):
    """Upcast f16 always; upcast bf16 only on chips without a bf16 VPU/EUP."""
    if dtype == jnp.float16:
        return True
    if dtype != jnp.bfloat16:
        return False
    try:
        kind = jax.devices()[0].device_kind.lower()
    except Exception:
        return True
    # v6e / v7x have native bf16 vector/transcendental paths; older gens do not.
    return not ("v6" in kind or "v7" in kind)


def _make_elementwise_kernel(functional, out_dtype, compute_dtype):
    def kernel(x_ref, o_ref):
        x = x_ref[...]
        if compute_dtype is not None and x.dtype != compute_dtype:
            x = x.astype(compute_dtype)
        o_ref[...] = functional(x).astype(out_dtype)
    return kernel


def _elementwise_call(functional, x, donate_input=False):
    """Flatten to a lane-dense 2D view and run with large (<=1024, 1024) tiles."""
    orig_shape, orig_dtype = x.shape, x.dtype
    total = x.size
    itemsize = jnp.dtype(orig_dtype).itemsize

    rows = _cdiv(total, _LANE)
    lane_pad = rows * _LANE - total

    flat = x.reshape(-1)
    if lane_pad:
        # Only the ragged tail (< 1024 elems) is padded so the flat view can be
        # reshaped lane-dense; padded with 1.0 so functionals undefined at 0
        # (log, 1/x, rsqrt) stay finite in the (discarded) pad lanes.
        flat = jnp.pad(flat, (0, lane_pad), constant_values=1)
    x2d = flat.reshape(rows, _LANE)

    # Sublane-aligned tile rows.  Keep >=2 grid steps when possible so the
    # "parallel" row grid can shard across v7x's two TensorCores; cap so
    # in+out double buffering stays well inside every generation's VMEM.
    if rows <= 8:
        tile_rows = rows
    else:
        tile_rows = min(_MAX_TILE_ROWS, _round_up(_cdiv(rows, 2), 8))
    grid = (_cdiv(rows, tile_rows),)

    compute_dtype = jnp.float32 if _needs_f32_upcast(orig_dtype) else None
    kernel = _make_elementwise_kernel(functional, orig_dtype, compute_dtype)

    eff_itemsize = 4 if compute_dtype is not None else itemsize
    tile_bytes = tile_rows * _LANE * max(itemsize, eff_itemsize)
    vmem_limit = int(min(48 * 1024 * 1024, max(32 * 1024 * 1024, 8 * tile_bytes)))

    out2d = pl.pallas_call(
        kernel,
        out_shape=jax.ShapeDtypeStruct((rows, _LANE), orig_dtype),
        grid_spec=pl.GridSpec(
            grid=grid,
            in_specs=[pl.BlockSpec((tile_rows, _LANE), lambda i: (i, 0))],
            out_specs=pl.BlockSpec((tile_rows, _LANE), lambda i: (i, 0)),
        ),
        compiler_params=pltpu.CompilerParams(
            dimension_semantics=("parallel",),
            vmem_limit_bytes=vmem_limit,
        ),
        cost_estimate=pl.CostEstimate(
            flops=0,
            transcendentals=rows * _LANE,
            bytes_accessed=2 * rows * _LANE * itemsize,
        ),
        input_output_aliases={0: 0} if donate_input else {},
    )(x2d)

    if lane_pad:
        return out2d.reshape(-1)[:total].reshape(orig_shape)
    return out2d.reshape(orig_shape)


def _per_sample_call(functional, x):
    """Per-sample (tile-local, non-elementwise) functionals.

    Samples are presented lane-dense as (n, prod(rest)); several samples are
    blocked per grid step and the functional is vmapped inside the kernel on
    the real per-sample shape, so stores are wide instead of 16-lane masked.
    """
    n = x.shape[0]
    rest = x.shape[1:]
    feat = math.prod(rest) if rest else 1
    orig_dtype = x.dtype
    itemsize = jnp.dtype(orig_dtype).itemsize

    x2d = x.reshape(n, feat)   # free, contiguous wrapper-side reshape

    if n <= 8:
        b_sub = n
    else:
        budget = max(8, (_PER_SAMPLE_TILE_BYTES // max(feat * itemsize, 1)) // 8 * 8)
        b_sub = max(8, min(budget, (n // 8) * 8))
    grid = (_cdiv(n, b_sub),)

    compute_dtype = jnp.float32 if _needs_f32_upcast(orig_dtype) else None

    def kernel(x_ref, o_ref):
        xb = x_ref[...]                                    # (b_sub, feat)
        if compute_dtype is not None:
            xb = xb.astype(compute_dtype)
        xs = xb.reshape((xb.shape[0],) + rest)             # per-sample view
        ys = jax.vmap(functional)(xs)                      # per-sample semantics
        o_ref[...] = ys.reshape(xb.shape[0], feat).astype(orig_dtype)

    out2d = pl.pallas_call(
        kernel,
        out_shape=jax.ShapeDtypeStruct((n, feat), orig_dtype),
        grid_spec=pl.GridSpec(
            grid=grid,
            in_specs=[pl.BlockSpec((b_sub, feat), lambda i: (i, 0))],
            out_specs=pl.BlockSpec((b_sub, feat), lambda i: (i, 0)),
        ),
        compiler_params=pltpu.CompilerParams(
            dimension_semantics=("parallel",),
        ),
        cost_estimate=pl.CostEstimate(
            flops=0,
            transcendentals=n * feat,
            bytes_accessed=2 * n * feat * itemsize,
        ),
    )(x2d)
    return out2d.reshape(x.shape)


def pallas_functional_module(functional, x, *, elementwise=True, donate_input=False):
    """JAX/Pallas equivalent of FunctionalModule(functional)(x).

    elementwise=True (default) flattens to a lane-dense view for maximum HBM
    bandwidth; ONLY valid if `functional` is truly elementwise.  Use
    elementwise=False for per-sample functionals (e.g. per-sample norm over
    all trailing dims); those are vmapped per sample inside the kernel.
    donate_input=True additionally aliases the input buffer to the output
    (elementwise path only).
    """
    # TODO(synk): functionals that change shape/dtype or need cross-tile /
    # cross-sample reductions are not expressible through this generic wrapper.
    if elementwise:
        return _elementwise_call(functional, x, donate_input=donate_input)
    return _per_sample_call(functional, x)


if __name__ == "__main__":
    key = jax.random.PRNGKey(0)
    k1, k2, k3 = jax.random.split(key, 3)

    functional = jnp.tanh

    # 1) Lane-aligned NCHW input (total % 1024 == 0 -> zero pad/slice traffic).
    x = jax.random.normal(k1, (2, 4, 16, 16), dtype=jnp.float32)
    ref = functional(x)
    out = jax.block_until_ready(pallas_functional_module(functional, x))
    assert out.shape == x.shape and out.dtype == x.dtype
    assert jnp.allclose(out, ref, atol=1e-6, rtol=1e-6)

    # 2) Ragged total (exercises the <1-lane tail pad with value 1.0).
    x_rag = jax.random.normal(k2, (3, 5, 7, 11), dtype=jnp.float32)
    out_rag = jax.block_until_ready(pallas_functional_module(functional, x_rag))
    assert jnp.allclose(out_rag, functional(x_rag), atol=1e-6, rtol=1e-6)

    # 3) >8 rows -> >=2 grid steps (v7x megacore split) + masked partial block,
    #    with input donation.
    x_big = jax.random.normal(k3, (17, 4, 16, 16), dtype=jnp.float32)
    ref_big = functional(x_big)
    out_big = jax.block_until_ready(
        pallas_functional_module(functional, x_big, donate_input=True))
    assert jnp.allclose(out_big, ref_big, atol=1e-6, rtol=1e-6)

    # 4) bf16 input: compute dtype gated on chip generation (native on v6e/v7x).
    x_bf = x.astype(jnp.bfloat16)
    out_bf = jax.block_until_ready(pallas_functional_module(functional, x_bf))
    assert out_bf.dtype == jnp.bfloat16
    assert jnp.allclose(out_bf.astype(jnp.float32),
                        functional(x_bf.astype(jnp.float32)),
                        atol=2e-2, rtol=2e-2)

    # 5) Per-sample (non-elementwise) fallback: per-sample standardization.
    per_sample_norm = lambda s: (s - s.mean()) / (s.std() + 1e-6)
    out_ps = jax.block_until_ready(
        pallas_functional_module(per_sample_norm, x, elementwise=False))
    ref_ps = jax.vmap(per_sample_norm)(x)
    assert jnp.allclose(out_ps, ref_ps, atol=1e-5, rtol=1e-5)

    print("KERNEL_OK")
</pallas_src>

<mosaic_0001>
module attributes {stable_mosaic.version = 11 : i64} {
  func.func @kernel(%arg0: i32, %arg1: memref<2x1024xf32, #tpu.memory_space<vmem>>, %arg2: memref<2x1024xf32, #tpu.memory_space<vmem>>) attributes {dimension_semantics = [#tpu.dimension_semantics<parallel>], iteration_bounds = array<i64: 1>, scalar_prefetch = 0 : i64, scratch_operands = 0 : i64, tpu.core_type = #tpu.core_type<tc>, window_params = [{transform_indices = @transform_0, window_bounds = array<i64: 2, 1024>}, {transform_indices = @transform_1, window_bounds = array<i64: 2, 1024>}]} {
    %c0 = arith.constant 0 : index
    %c0_0 = arith.constant 0 : index
    %0 = vector.load %arg1[%c0, %c0_0] : memref<2x1024xf32, #tpu.memory_space<vmem>>, vector<2x1024xf32>
    %1 = math.tanh %0 : vector<2x1024xf32>
    %c0_1 = arith.constant 0 : index
    %c0_2 = arith.constant 0 : index
    %2 = vector.load %arg2[%c0_1, %c0_2] : memref<2x1024xf32, #tpu.memory_space<vmem>>, vector<2x1024xf32>
    tpu.vector_store %arg2[%c0_1, %c0_2], %1 {strides = array<i32>} : memref<2x1024xf32, #tpu.memory_space<vmem>>, vector<2x1024xf32>,
    return
  }
  func.func @transform_0(%arg0: i32) -> (i32, i32) {
    %c0_i32 = arith.constant 0 : i32
    %c0_i32_0 = arith.constant 0 : i32
    return %arg0, %c0_i32 : i32, i32
  }
  func.func @transform_1(%arg0: i32) -> (i32, i32) {
    %c0_i32 = arith.constant 0 : i32
    %c0_i32_0 = arith.constant 0 : i32
    return %arg0, %c0_i32 : i32, i32
  }
}

</mosaic_0001>

<bundles_post_ra>
// kernel: tpu_custom_call.1
= control target key start
LH: loop header
LB: loop body
LE: loop exit
PB: predicated region body
PF: predicated region fallthrough
CT: control target
= control target key end

     0   :  { %6 = vsyncpa [#allocation3], 0  ;;  %s110_s0 = inlined_call_operand.hbm [shape: f32[2,1024], index: 0, kind: input, shape index: {}]   ;;  %s111_s1 = inlined_call_operand.hbm [shape: f32[2,1024], index: 1, kind: output, shape index: {}]  }
   0x1   :  { %7 = vsyncpa [#allocation4], 0  ;;  %s92_s6 = smov [#allocation2]  }
   0x2   :  { %s14_s7 = sshll.u32 %s92_s6, 4  ;;  %s15_s7 = int_to_ptr.vmem [resolvable:$true] %s14_s7 }
   0x3   :  { %s56_s8 = scalar_lea.vmem %s15_s7, 256  ;;  %p61_p1 = scmp.lt.s32.totalorder %s15_s7, %s15_s7 }
   0x4   :  { %p57_p0 = scmp.ne.s32.totalorder %s15_s7, %s56_s8  ;;  %p62_p2 = scmp.lt.s32.totalorder %s56_s8, %s56_s8 }
   0x6   :  { %p63_p3 = por %p62_p2, %p61_p1 }
   0x8   :  { %p64_p4 = pnand %p63_p3, %p57_p0 }
   0xa   :  { %67 = shalt.err (!%p64_p4)
}
   0xb   :  { %17 = dma.hbm_to_vmem [thread:$0]  %s110_s0, 256, %s15_s7, [#allocation3]  }
   0xc   :  { %88 = dma.done.wait [#allocation3], 256  }
   0xd   :  { %89 = vsyncadd [#allocation3], 4294967040  ;;  %v21_v0 = vld [vmem:[#allocation2] sm:$0xff]  ;;  %v22_v1 = vld [vmem:[#allocation2 + $0x8] sm:$0xff]  ;;  %s93_s11 = smov [#allocation5]  }
   0xe   :  { %44 = vtanh.f32 %v21_v0  ;;  %s33_s12 = sshll.u32 %s93_s11, 4  ;;  %s34_s12 = int_to_ptr.vmem [resolvable:$true] %s33_s12 }
   0xf   :  { %46 = vtanh.f32 %v22_v1  ;;  %s68_s13 = scalar_lea.vmem %s34_s12, 256  ;;  %p73_p6 = scmp.lt.s32.totalorder %s34_s12, %s34_s12 }
  0x10   :  { %p69_p5 = scmp.ne.s32.totalorder %s34_s12, %s68_s13  ;;  %p74_p7 = scmp.lt.s32.totalorder %s68_s13, %s68_s13 }
  0x12   :  { %p75_p8 = por %p74_p7, %p73_p6 }
  0x14   :  { %p76_p9 = pnand %p75_p8, %p69_p5 }
  0x1b   :  { %v45_v2 = vpop.eup %44 }
  0x1c   :  { %v47_v3 = vpop.eup %46  ;;  %25 = vst [vmem:[#allocation5] sm:$0xff] %v45_v2 }
  0x1d   :  { %26 = vst [vmem:[#allocation5 + $0x8] sm:$0xff] %v47_v3 }
  0x1e   :  { %79 = shalt.err (!%p76_p9)
}
  0x1f   :  { %36 = dma.vmem_to_hbm [thread:$0]  %s34_s12, 256, %s111_s1, [#allocation4]  }
  0x20   :  { %90 = dma.done.wait [#allocation4], 256  }
  0x21   :  { %91 = vsyncadd [#allocation4], 4294967040 }
  0x22   :  { %40 = vsyncpa [#allocation3], 1 }
  0x23   :  { %41 = vsyncpa [#allocation4], 1 }

</bundles_post_ra>
